<compile_context>
chip_gen: v7x
topology: tpu7x:2x2x1
jax: 0.10.0
libtpu: 0.0.40
codegen_flags: <defaults>
</compile_context>

<pallas_src>
import functools
import math

import jax
import jax.numpy as jnp
from jax.experimental import pallas as pl
from jax.experimental.pallas import tpu as pltpu

_COL_CHOICES = (1024, 512, 256, 128)  # lane-dense slab widths (multiples of 128)


def _resolve_shape(in_shape, target_shape):
    """Resolve a single -1 (PyTorch .view semantics).  Raises on mismatch."""
    total = math.prod(in_shape) if in_shape else 1
    target = list(target_shape)
    if target.count(-1) > 1:
        raise ValueError("view(): only one dimension may be -1")
    if -1 in target:
        idx = target.index(-1)
        known = 1
        for j, d in enumerate(target):
            if j != idx:
                known *= d
        if known <= 0 or total % known != 0:
            raise ValueError(
                f"cannot infer -1 in view shape {tuple(target_shape)} "
                f"for input shape {tuple(in_shape)}")
        target[idx] = total // known
    if math.prod(target) != total:
        raise ValueError(
            f"view shape {tuple(target_shape)} incompatible with input shape "
            f"{tuple(in_shape)}")
    return tuple(target)


def _round_up(n, m):
    return ((n + m - 1) // m) * m


def _round_down(n, m):
    return (n // m) * m


@functools.lru_cache(maxsize=1)
def _chip_config():
    """Per-generation (tile_bytes, vmem_limit_bytes)."""
    try:
        kind = jax.devices()[0].device_kind.lower()
    except Exception:  # pragma: no cover - defensive
        kind = ""
    if "v7" in kind:
        # 64 MiB VMEM/TC: 4 x 8 MiB live buffers + headroom.
        return 8 << 20, 48 << 20
    if "v6" in kind:
        # 128 MiB physical VMEM; raise scoped limit past the 32 MiB default.
        return 8 << 20, 64 << 20
    if "v5" in kind:
        # ~820 GB/s HBM: per-step overhead already small at 4 MiB tiles.
        return 4 << 20, 32 << 20
    # Unknown chip: conservative sizes that fit every generation.
    return 4 << 20, 32 << 20


def _copy_kernel(x_ref, o_ref):
    # Pure same-shape copy: lowers to straight vld/vst at HBM bandwidth.
    o_ref[...] = x_ref[...]


def view(x, *shape, donate_input=False):
    """Pallas equivalent of `View(*shape)(x)` == x.view(*shape)."""
    out_shape = _resolve_shape(x.shape, shape)
    total = math.prod(x.shape) if x.shape else 1
    itemsize = jnp.dtype(x.dtype).itemsize

    # Pick the widest lane-dense column count that divides the total exactly,
    # so there is NO wrapper-side pad/slice (each would be an extra full HBM
    # pass).  Otherwise fall back to the metadata-only reshape (0 bytes moved),
    # which is strictly optimal for the ragged standalone case anyway.
    cols = None
    if total > 0:
        for c in _COL_CHOICES:
            if total % c == 0:
                cols = c
                break
    if cols is None:
        return jnp.reshape(x, out_shape)

    sublane_mult = 8 * max(1, 4 // itemsize)  # 8 (f32) / 16 (bf16) / 32 (int8)
    rows = total // cols

    tile_bytes, vmem_limit = _chip_config()
    # Byte-budgeted tile rows (multiple of the dtype's sublane packing).
    budget_rows = max(sublane_mult,
                      _round_down(tile_bytes // (cols * itemsize), sublane_mult))
    tile_rows = min(budget_rows, _round_up(rows, sublane_mult))
    # Keep grid >= 2 when the tensor allows it so v7x can shard row-blocks
    # across its 2 TensorCores (negligible cost on single-TC chips).
    if rows >= 2 * sublane_mult:
        tile_rows = min(tile_rows, _round_up(pl.cdiv(rows, 2), sublane_mult))
    tile_rows = max(tile_rows, sublane_mult)

    grid = (pl.cdiv(rows, tile_rows),)  # partial last block is masked by Pallas

    # Metadata-only flatten to the lane-dense slab (row-major, same as .view).
    slab = jnp.reshape(x, (rows, cols))

    out_slab = pl.pallas_call(
        _copy_kernel,
        out_shape=jax.ShapeDtypeStruct((rows, cols), x.dtype),
        grid=grid,
        in_specs=[pl.BlockSpec((tile_rows, cols), lambda i: (i, 0))],
        out_specs=pl.BlockSpec((tile_rows, cols), lambda i: (i, 0)),
        compiler_params=pltpu.CompilerParams(
            dimension_semantics=("parallel",),
            vmem_limit_bytes=vmem_limit),
        cost_estimate=pl.CostEstimate(
            flops=0,
            transcendentals=0,
            bytes_accessed=2 * total * itemsize),
        input_output_aliases=({0: 0} if donate_input else {}),
    )(slab)

    # Metadata-only reshape to the requested view shape.
    return jnp.reshape(out_slab, out_shape)


class View:
    """Mirror of the PyTorch nn.Module, backed by the Pallas copy kernel."""

    def __init__(self, *shape):
        self.shape = shape

    def __call__(self, x):
        return view(x, *self.shape)


if __name__ == "__main__":
    key = jax.random.PRNGKey(0)

    # 1) Typical usage: flatten NCHW conv features.  (2,4,16,16) -> (2,1024).
    x = jax.random.normal(key, (2, 4, 16, 16), dtype=jnp.float32)
    out = jax.block_until_ready(View(2, -1)(x))
    assert out.shape == (2, 1024)
    assert out.dtype == x.dtype
    assert bool(jnp.array_equal(out, jnp.reshape(x, (2, -1))))

    # 2) Lane-multiple but not tile-aligned total: exercises the partial last
    #    row-block (masked by Pallas, no wrapper pad/slice).
    y = jax.random.normal(jax.random.PRNGKey(1), (5, 7, 128), dtype=jnp.float32)
    out2 = jax.block_until_ready(View(-1, 128)(y))
    assert out2.shape == (35, 128)
    assert bool(jnp.array_equal(out2, jnp.reshape(y, (35, 128))))

    # 3) bf16 path (different sublane packing / byte-budgeted tile).
    z = jax.random.normal(jax.random.PRNGKey(2), (4, 16, 48),
                          dtype=jnp.bfloat16)
    out3 = jax.block_until_ready(View(12, 256)(z))
    assert out3.shape == (12, 256) and out3.dtype == jnp.bfloat16
    assert bool(jnp.array_equal(out3, jnp.reshape(z, (12, 256))))

    # 4) Ragged total (105 elements): metadata-only fallback, zero bytes moved.
    w = jax.random.normal(jax.random.PRNGKey(3), (3, 5, 7), dtype=jnp.float32)
    out4 = jax.block_until_ready(View(-1)(w))
    assert out4.shape == (105,)
    assert bool(jnp.array_equal(out4, jnp.reshape(w, (-1,))))

    print("KERNEL_OK")
</pallas_src>

<mosaic_0001>
module attributes {stable_mosaic.version = 11 : i64} {
  func.func @_copy_kernel(%arg0: i32, %arg1: memref<8x1024xf32, #tpu.memory_space<vmem>>, %arg2: memref<8x1024xf32, #tpu.memory_space<vmem>>) attributes {dimension_semantics = [#tpu.dimension_semantics<parallel>], iteration_bounds = array<i64: 1>, scalar_prefetch = 0 : i64, scratch_operands = 0 : i64, tpu.core_type = #tpu.core_type<tc>, window_params = [{transform_indices = @transform_0, window_bounds = array<i64: 8, 1024>}, {transform_indices = @transform_1, window_bounds = array<i64: 8, 1024>}]} {
    %c0 = arith.constant 0 : index
    %c0_0 = arith.constant 0 : index
    %0 = vector.load %arg1[%c0, %c0_0] : memref<8x1024xf32, #tpu.memory_space<vmem>>, vector<8x1024xf32>
    %c0_1 = arith.constant 0 : index
    %c0_2 = arith.constant 0 : index
    %1 = vector.load %arg2[%c0_1, %c0_2] : memref<8x1024xf32, #tpu.memory_space<vmem>>, vector<8x1024xf32>
    tpu.vector_store %arg2[%c0_1, %c0_2], %0 {strides = array<i32>} : memref<8x1024xf32, #tpu.memory_space<vmem>>, vector<8x1024xf32>,
    return
  }
  func.func @transform_0(%arg0: i32) -> (i32, i32) {
    %c0_i32 = arith.constant 0 : i32
    %c0_i32_0 = arith.constant 0 : i32
    return %arg0, %c0_i32 : i32, i32
  }
  func.func @transform_1(%arg0: i32) -> (i32, i32) {
    %c0_i32 = arith.constant 0 : i32
    %c0_i32_0 = arith.constant 0 : i32
    return %arg0, %c0_i32 : i32, i32
  }
}

</mosaic_0001>

<bundles_post_ra>
// kernel: tpu_custom_call.1
= control target key start
LH: loop header
LB: loop body
LE: loop exit
PB: predicated region body
PF: predicated region fallthrough
CT: control target
= control target key end

     0   :  { %6 = vsyncpa [#allocation3], 0  ;;  %s152_s0 = inlined_call_operand.hbm [shape: f32[2,1024], index: 0, kind: input, shape index: {}]   ;;  %s153_s1 = inlined_call_operand.hbm [shape: f32[2,1024], index: 1, kind: output, shape index: {}]  }
   0x1   :  { %7 = vsyncpa [#allocation4], 0 }
   0x2   :  { %12 = vsyncadd [#allocation3], 768  ;;  %s108_s6 = smov [#allocation2]   ;;  %s60_s10 = scalar_lea.hbm %s152_s0, 256 }
   0x3   :  { %s13_s7 = sshll.u32 %s108_s6, 4  ;;  %p61_p0 = scmp.ne.s32.totalorder %s152_s0, %s60_s10  ;;  %s14_s7 = int_to_ptr.vmem [resolvable:$true] %s13_s7 }
   0x4   :  { %p64_p1 = scmp.lt.u32.totalorder %s60_s10, %s152_s0 }
   0x6   :  { %p66_p2 = pnand %p64_p1, %p61_p0 }
   0x8   :  { %69 = shalt.err (!%p66_p2)
}
   0x9   :  { %s70_s15 = scalar_lea.vmem %s14_s7, 256  ;;  %s74_s16 = scalar_lea.vmem %s14_s7, 1024 }
   0xa   :  { %p71_p3 = scmp.ne.s32.totalorder %s14_s7, %s70_s15  ;;  %p75_p4 = scmp.lt.s32.totalorder %s14_s7, %s14_s7 }
   0xb   :  { %p76_p5 = scmp.lt.s32.totalorder %s74_s16, %s70_s15 }
   0xd   :  { %p77_p6 = por %p76_p5, %p75_p4 }
   0xf   :  { %p78_p7 = pnand %p77_p6, %p71_p3 }
  0x11   :  { %81 = shalt.err (!%p78_p7)
}
  0x12   :  { %s109_s17 = smov 256   ;;  %s110_s18 = smov 16  }
  0x13   :  { %19 = dma.hbm_to_vmem [thread:$0]  %s152_s0, 256, %s14_s7, [#allocation3], %s109_s17, %s109_s17, %s110_s18  }
  0x14   :  { %104 = dma.done.wait [#allocation3], 1024  }
  0x15   :  { %105 = vsyncadd [#allocation3], 4294966272  ;;  %v23_v0 = vld [vmem:[#allocation2] sm:$0xff]  ;;  %v24_v1 = vld [vmem:[#allocation2 + $0x8] sm:$0xff] }
  0x16   :  { %v25_v2 = vld [vmem:[#allocation2 + $0x10] sm:$0xff]  ;;  %31 = vst [vmem:[#allocation5] sm:$0xff] %v23_v0  ;;  %32 = vst [vmem:[#allocation5 + $0x8] sm:$0xff] %v24_v1  ;;  %v26_v3 = vld [vmem:[#allocation2 + $0x18] sm:$0xff] }
  0x17   :  { %33 = vst [vmem:[#allocation5 + $0x10] sm:$0xff] %v25_v2  ;;  %v27_v4 = vld [vmem:[#allocation2 + $0x20] sm:$0xff]  ;;  %v28_v5 = vld [vmem:[#allocation2 + $0x28] sm:$0xff]  ;;  %34 = vst [vmem:[#allocation5 + $0x18] sm:$0xff] %v26_v3 }
  0x18   :  { %35 = vst [vmem:[#allocation5 + $0x20] sm:$0xff] %v27_v4  ;;  %36 = vst [vmem:[#allocation5 + $0x28] sm:$0xff] %v28_v5  ;;  %v29_v6 = vld [vmem:[#allocation2 + $0x30] sm:$0xff]  ;;  %v30_v7 = vld [vmem:[#allocation2 + $0x38] sm:$0xff] }
  0x19   :  { %37 = vst [vmem:[#allocation5 + $0x30] sm:$0xff] %v29_v6  ;;  %38 = vst [vmem:[#allocation5 + $0x38] sm:$0xff] %v30_v7 }
  0x1a   :  { %43 = vsyncadd [#allocation4], 768  ;;  %s111_s0 = smov [#allocation5]  }
  0x1b   :  { %s44_s21 = sshll.u32 %s111_s0, 4  ;;  %s45_s21 = int_to_ptr.vmem [resolvable:$true] %s44_s21 }
  0x1c   :  { %s82_s22 = scalar_lea.vmem %s45_s21, 256  ;;  %s86_s23 = scalar_lea.vmem %s45_s21, 1024 }
  0x1d   :  { %p83_p8 = scmp.ne.s32.totalorder %s45_s21, %s82_s22  ;;  %p87_p9 = scmp.lt.s32.totalorder %s45_s21, %s45_s21 }
  0x1e   :  { %p88_p10 = scmp.lt.s32.totalorder %s86_s23, %s82_s22 }
  0x20   :  { %p89_p11 = por %p88_p10, %p87_p9 }
  0x22   :  { %p90_p12 = pnand %p89_p11, %p83_p8 }
  0x24   :  { %93 = shalt.err (!%p90_p12)
}
  0x25   :  { %s94_s26 = scalar_lea.hbm %s153_s1, 256 }
  0x26   :  { %p95_p13 = scmp.ne.s32.totalorder %s153_s1, %s94_s26  ;;  %p98_p0 = scmp.lt.u32.totalorder %s94_s26, %s153_s1 }
  0x28   :  { %p100_p1 = pnand %p98_p0, %p95_p13 }
  0x2a   :  { %103 = shalt.err (!%p100_p1)
}
  0x2b   :  { %50 = dma.vmem_to_hbm [thread:$0]  %s45_s21, 256, %s153_s1, [#allocation4], %s109_s17, %s109_s17, %s110_s18  }
  0x2c   :  { %106 = dma.done.wait [#allocation4], 1024  }
  0x2d   :  { %107 = vsyncadd [#allocation4], 4294966272 }
  0x2e   :  { %54 = vsyncpa [#allocation3], 1 }
  0x2f   :  { %55 = vsyncpa [#allocation4], 1 }

</bundles_post_ra>
